<compile_context>
chip_gen: v6e
topology: v6e:2x2x1
jax: 0.10.0
libtpu: 0.0.40
codegen_flags: <defaults>
</compile_context>

<pallas_src>
import jax
import jax.numpy as jnp
from jax.experimental import pallas as pl
from jax.experimental.pallas import tpu as pltpu

HIDDEN = 32          # per-head hidden width (PyTorch spec: Linear(.., 32))
TB_MAX = 4096        # max batch-tile rows (kernel is step-overhead bound below this)
SPLIT_BATCH = 512    # above this, force >= 2 grid steps so both v7x TCs get work
VMEM_LIMIT = 32 * 1024 * 1024   # lets the 4096-row tile compile on v5e too


def _round_up(x, m):
    return ((x + m - 1) // m) * m


def _critic_kernel(s_ref, a_ref,
                   w1s_ref, w1a_ref, b1_ref,
                   w2_ref, b2_ref,
                   w3_ref, b3_ref,
                   q_ref):
    # Layer 1 of both heads, concat-free: state @ W1[:S] + action @ W1[S:].
    # (Keeping two dots: a single fused dot would need a lane-shift of the
    #  action block that costs the same vex-slot ops as the extra MXU pass.)
    h = jnp.tanh(
        jnp.dot(s_ref[...], w1s_ref[...], preferred_element_type=jnp.float32)
        + jnp.dot(a_ref[...], w1a_ref[...], preferred_element_type=jnp.float32)
        + b1_ref[...])
    # Layer 2 (block-diagonal [W2 0; 0 W5]): (tb, 64)
    h = jnp.tanh(jnp.dot(h, w2_ref[...],
                         preferred_element_type=jnp.float32) + b2_ref[...])
    # Layer 3 (block-diagonal (64, 2)): lane 0 = q1, lane 1 = q2
    q = jax.nn.sigmoid(jnp.dot(h, w3_ref[...],
                               preferred_element_type=jnp.float32) + b3_ref[...])
    q_ref[...] = q.astype(q_ref.dtype)


def init_critic_params(key, state_dim, action_dim):
    """PyTorch-Linear-style uniform init. Weights stored as (in, out)."""
    in_dim = state_dim + action_dim
    dims = [(in_dim, HIDDEN), (HIDDEN, HIDDEN), (HIDDEN, 1),   # Q1: l1, l2, l3
            (in_dim, HIDDEN), (HIDDEN, HIDDEN), (HIDDEN, 1)]   # Q2: l4, l5, l6
    params = []
    keys = jax.random.split(key, 2 * len(dims))
    for i, (fan_in, fan_out) in enumerate(dims):
        bound = 1.0 / jnp.sqrt(float(fan_in))
        w = jax.random.uniform(keys[2 * i], (fan_in, fan_out),
                               minval=-bound, maxval=bound, dtype=jnp.float32)
        b = jax.random.uniform(keys[2 * i + 1], (1, fan_out),
                               minval=-bound, maxval=bound, dtype=jnp.float32)
        params.append((w, b))
    return params


def pack_critic_params(params, state_dim):
    """Fuse the two heads into 3 MXU-friendly weight matrices.

    Call this ONCE whenever the parameters change (not per forward call) and
    pass the returned tuple to critic_forward.
    """
    (w1, b1), (w2, b2), (w3, b3), (w4, b4), (w5, b5), (w6, b6) = params
    H = HIDDEN
    w1f = jnp.concatenate([w1, w4], axis=1).astype(jnp.float32)   # (in_dim, 2H)
    b1f = jnp.concatenate([b1, b4], axis=1).astype(jnp.float32)   # (1, 2H)
    w2f = (jnp.zeros((2 * H, 2 * H), jnp.float32)
           .at[:H, :H].set(w2).at[H:, H:].set(w5))                # (2H, 2H)
    b2f = jnp.concatenate([b2, b5], axis=1).astype(jnp.float32)   # (1, 2H)
    w3f = (jnp.zeros((2 * H, 2), jnp.float32)
           .at[:H, 0:1].set(w3).at[H:, 1:2].set(w6))              # (2H, 2)
    b3f = jnp.concatenate([b3, b6], axis=1).astype(jnp.float32)   # (1, 2)
    # Split W1 over the state/action rows so the kernel never needs a concat.
    return (w1f[:state_dim], w1f[state_dim:], b1f, w2f, b2f, w3f, b3f)


def critic_forward(state, action, packed_params):
    """Pallas implementation of Critic.forward -> (q1, q2), each (batch, 1).

    `packed_params` is the output of pack_critic_params (packed once, reused).
    """
    w1s, w1a, b1f, w2f, b2f, w3f, b3f = packed_params
    state = state.astype(jnp.float32)
    action = action.astype(jnp.float32)
    batch, state_dim = state.shape
    action_dim = action.shape[1]

    # Batch tiling: as few grid steps as possible (per-step overhead bound),
    # but at least 2 steps once batch >= SPLIT_BATCH so both v7x TCs get work.
    if batch >= SPLIT_BATCH:
        tb = min(TB_MAX, _round_up(pl.cdiv(batch, 2), 8))
    else:
        tb = max(8, _round_up(batch, 8))
    grid = (pl.cdiv(batch, tb),)   # no input padding; boundary block is masked

    rows = lambda i: (i, 0)      # batch-tiled operands
    pinned = lambda i: (0, 0)    # weights/biases stay resident across the grid

    q = pl.pallas_call(
        _critic_kernel,
        out_shape=jax.ShapeDtypeStruct((batch, 2), jnp.float32),
        grid=grid,
        in_specs=[
            pl.BlockSpec((tb, state_dim), rows),
            pl.BlockSpec((tb, action_dim), rows),
            pl.BlockSpec(w1s.shape, pinned),
            pl.BlockSpec(w1a.shape, pinned),
            pl.BlockSpec(b1f.shape, pinned),
            pl.BlockSpec(w2f.shape, pinned),
            pl.BlockSpec(b2f.shape, pinned),
            pl.BlockSpec(w3f.shape, pinned),
            pl.BlockSpec(b3f.shape, pinned),
        ],
        out_specs=pl.BlockSpec((tb, 2), rows),
        compiler_params=pltpu.CompilerParams(
            dimension_semantics=("parallel",),
            vmem_limit_bytes=VMEM_LIMIT),
    )(state, action, w1s, w1a, b1f, w2f, b2f, w3f, b3f)

    return q[:, 0:1], q[:, 1:2]


def critic_reference(state, action, params):
    """Pure-JAX reference mirroring the PyTorch forward."""
    sa = jnp.concatenate([state, action], axis=1).astype(jnp.float32)
    (w1, b1), (w2, b2), (w3, b3), (w4, b4), (w5, b5), (w6, b6) = params
    q1 = jnp.tanh(sa @ w1 + b1)
    q1 = jnp.tanh(q1 @ w2 + b2)
    q1 = jax.nn.sigmoid(q1 @ w3 + b3)
    q2 = jnp.tanh(sa @ w4 + b4)
    q2 = jnp.tanh(q2 @ w5 + b5)
    q2 = jax.nn.sigmoid(q2 @ w6 + b6)
    return q1, q2


if __name__ == "__main__":
    state_dim, action_dim = 8, 4
    key = jax.random.PRNGKey(0)
    k_state, k_action, k_params, k_state2, k_action2 = jax.random.split(key, 5)
    params = init_critic_params(k_params, state_dim, action_dim)
    packed = pack_critic_params(params, state_dim)   # packed once, reused

    forward = jax.jit(critic_forward)

    # Small-shape check (batch=2, matches the module's toy usage; exercises the
    # masked boundary block since batch < tile).
    batch = 2
    state = jax.random.normal(k_state, (batch, state_dim), dtype=jnp.float32)
    action = jax.random.normal(k_action, (batch, action_dim), dtype=jnp.float32)
    q1, q2 = forward(state, action, packed)
    q1 = jax.block_until_ready(q1)
    q2 = jax.block_until_ready(q2)
    q1_ref, q2_ref = critic_reference(state, action, params)
    assert q1.shape == (batch, 1) and q2.shape == (batch, 1)
    assert jnp.allclose(q1, q1_ref, atol=1e-5, rtol=1e-5)
    assert jnp.allclose(q2, q2_ref, atol=1e-5, rtol=1e-5)

    # Multi-tile check (exercises the 2-step grid split without any padding).
    batch2 = 2304
    state2 = jax.random.normal(k_state2, (batch2, state_dim), dtype=jnp.float32)
    action2 = jax.random.normal(k_action2, (batch2, action_dim), dtype=jnp.float32)
    q1b, q2b = forward(state2, action2, packed)
    q1b = jax.block_until_ready(q1b)
    q2b = jax.block_until_ready(q2b)
    q1b_ref, q2b_ref = critic_reference(state2, action2, params)
    assert q1b.shape == (batch2, 1) and q2b.shape == (batch2, 1)
    assert jnp.allclose(q1b, q1b_ref, atol=1e-5, rtol=1e-5)
    assert jnp.allclose(q2b, q2b_ref, atol=1e-5, rtol=1e-5)

    print("KERNEL_OK")
</pallas_src>

<mosaic_0001>
module attributes {stable_mosaic.version = 11 : i64} {
  func.func @_critic_kernel(%arg0: i32, %arg1: memref<8x8xf32, #tpu.memory_space<vmem>>, %arg2: memref<8x4xf32, #tpu.memory_space<vmem>>, %arg3: memref<8x64xf32, #tpu.memory_space<vmem>>, %arg4: memref<4x64xf32, #tpu.memory_space<vmem>>, %arg5: memref<1x64xf32, #tpu.memory_space<vmem>>, %arg6: memref<64x64xf32, #tpu.memory_space<vmem>>, %arg7: memref<1x64xf32, #tpu.memory_space<vmem>>, %arg8: memref<64x2xf32, #tpu.memory_space<vmem>>, %arg9: memref<1x2xf32, #tpu.memory_space<vmem>>, %arg10: memref<8x2xf32, #tpu.memory_space<vmem>>) attributes {dimension_semantics = [#tpu.dimension_semantics<parallel>], iteration_bounds = array<i64: 1>, scalar_prefetch = 0 : i64, scratch_operands = 0 : i64, tpu.core_type = #tpu.core_type<tc>, window_params = [{transform_indices = @transform_0, window_bounds = array<i64: 8, 8>}, {transform_indices = @transform_1, window_bounds = array<i64: 8, 4>}, {pipeline_mode = #tpu.pipeline_mode<synchronous>, transform_indices = @transform_2, window_bounds = array<i64: 8, 64>}, {pipeline_mode = #tpu.pipeline_mode<synchronous>, transform_indices = @transform_3, window_bounds = array<i64: 4, 64>}, {pipeline_mode = #tpu.pipeline_mode<synchronous>, transform_indices = @transform_4, window_bounds = array<i64: 1, 64>}, {pipeline_mode = #tpu.pipeline_mode<synchronous>, transform_indices = @transform_5, window_bounds = array<i64: 64, 64>}, {pipeline_mode = #tpu.pipeline_mode<synchronous>, transform_indices = @transform_6, window_bounds = array<i64: 1, 64>}, {pipeline_mode = #tpu.pipeline_mode<synchronous>, transform_indices = @transform_7, window_bounds = array<i64: 64, 2>}, {pipeline_mode = #tpu.pipeline_mode<synchronous>, transform_indices = @transform_8, window_bounds = array<i64: 1, 2>}, {transform_indices = @transform_9, window_bounds = array<i64: 8, 2>}]} {
    %c0 = arith.constant 0 : index
    %c0_0 = arith.constant 0 : index
    %0 = vector.load %arg1[%c0, %c0_0] : memref<8x8xf32, #tpu.memory_space<vmem>>, vector<8x8xf32>
    %c0_1 = arith.constant 0 : index
    %c0_2 = arith.constant 0 : index
    %1 = vector.load %arg3[%c0_1, %c0_2] : memref<8x64xf32, #tpu.memory_space<vmem>>, vector<8x64xf32>
    %cst = arith.constant dense<0.000000e+00> : vector<8x64xf32>
    %2 = tpu.matmul %0, %1, %cst {dimension_numbers = #tpu.dot_dimension_numbers<[1], [0], [0], [1], [0, 0, 1, 1], [], []>} : vector<8x8xf32>, vector<8x64xf32>, vector<8x64xf32> -> vector<8x64xf32>
    %c0_3 = arith.constant 0 : index
    %c0_4 = arith.constant 0 : index
    %3 = vector.load %arg2[%c0_3, %c0_4] : memref<8x4xf32, #tpu.memory_space<vmem>>, vector<8x4xf32>
    %c0_5 = arith.constant 0 : index
    %c0_6 = arith.constant 0 : index
    %4 = vector.load %arg4[%c0_5, %c0_6] : memref<4x64xf32, #tpu.memory_space<vmem>>, vector<4x64xf32>
    %cst_7 = arith.constant dense<0.000000e+00> : vector<8x64xf32>
    %5 = tpu.matmul %3, %4, %cst_7 {dimension_numbers = #tpu.dot_dimension_numbers<[1], [0], [0], [1], [0, 0, 1, 1], [], []>} : vector<8x4xf32>, vector<4x64xf32>, vector<8x64xf32> -> vector<8x64xf32>
    %6 = arith.addf %2, %5 : vector<8x64xf32>
    %c0_8 = arith.constant 0 : index
    %c0_9 = arith.constant 0 : index
    %7 = vector.load %arg5[%c0_8, %c0_9] : memref<1x64xf32, #tpu.memory_space<vmem>>, vector<1x64xf32>
    %8 = vector.broadcast %7 : vector<1x64xf32> to vector<8x64xf32>
    %9 = arith.addf %6, %8 : vector<8x64xf32>
    %10 = math.tanh %9 : vector<8x64xf32>
    %c0_10 = arith.constant 0 : index
    %c0_11 = arith.constant 0 : index
    %11 = vector.load %arg6[%c0_10, %c0_11] : memref<64x64xf32, #tpu.memory_space<vmem>>, vector<64x64xf32>
    %cst_12 = arith.constant dense<0.000000e+00> : vector<8x64xf32>
    %12 = tpu.matmul %10, %11, %cst_12 {dimension_numbers = #tpu.dot_dimension_numbers<[1], [0], [0], [1], [0, 0, 1, 1], [], []>} : vector<8x64xf32>, vector<64x64xf32>, vector<8x64xf32> -> vector<8x64xf32>
    %c0_13 = arith.constant 0 : index
    %c0_14 = arith.constant 0 : index
    %13 = vector.load %arg7[%c0_13, %c0_14] : memref<1x64xf32, #tpu.memory_space<vmem>>, vector<1x64xf32>
    %14 = vector.broadcast %13 : vector<1x64xf32> to vector<8x64xf32>
    %15 = arith.addf %12, %14 : vector<8x64xf32>
    %16 = math.tanh %15 : vector<8x64xf32>
    %c0_15 = arith.constant 0 : index
    %c0_16 = arith.constant 0 : index
    %17 = vector.load %arg8[%c0_15, %c0_16] : memref<64x2xf32, #tpu.memory_space<vmem>>, vector<64x2xf32>
    %cst_17 = arith.constant dense<0.000000e+00> : vector<8x2xf32>
    %18 = tpu.matmul %16, %17, %cst_17 {dimension_numbers = #tpu.dot_dimension_numbers<[1], [0], [0], [1], [0, 0, 1, 1], [], []>} : vector<8x64xf32>, vector<64x2xf32>, vector<8x2xf32> -> vector<8x2xf32>
    %c0_18 = arith.constant 0 : index
    %c0_19 = arith.constant 0 : index
    %19 = vector.load %arg9[%c0_18, %c0_19] : memref<1x2xf32, #tpu.memory_space<vmem>>, vector<1x2xf32>
    %20 = vector.broadcast %19 : vector<1x2xf32> to vector<8x2xf32>
    %21 = arith.addf %18, %20 : vector<8x2xf32>
    %22 = arith.negf %21 : vector<8x2xf32>
    %23 = math.exp %22 : vector<8x2xf32>
    %cst_20 = arith.constant 1.000000e+00 : f32
    %24 = vector.broadcast %cst_20 : f32 to vector<8x2xf32>
    %25 = arith.addf %24, %23 : vector<8x2xf32>
    %26 = arith.divf %24, %25 : vector<8x2xf32>
    %c0_21 = arith.constant 0 : index
    %c0_22 = arith.constant 0 : index
    %27 = vector.load %arg10[%c0_21, %c0_22] : memref<8x2xf32, #tpu.memory_space<vmem>>, vector<8x2xf32>
    tpu.vector_store %arg10[%c0_21, %c0_22], %26 {strides = array<i32>} : memref<8x2xf32, #tpu.memory_space<vmem>>, vector<8x2xf32>,
    return
  }
  func.func @transform_0(%arg0: i32) -> (i32, i32) {
    %c0_i32 = arith.constant 0 : i32
    %c0_i32_0 = arith.constant 0 : i32
    return %arg0, %c0_i32 : i32, i32
  }
  func.func @transform_1(%arg0: i32) -> (i32, i32) {
    %c0_i32 = arith.constant 0 : i32
    %c0_i32_0 = arith.constant 0 : i32
    return %arg0, %c0_i32 : i32, i32
  }
  func.func @transform_2(%arg0: i32) -> (i32, i32) {
    %c0_i32 = arith.constant 0 : i32
    %c0_i32_0 = arith.constant 0 : i32
    %c0_i32_1 = arith.constant 0 : i32
    return %c0_i32, %c0_i32_0 : i32, i32
  }
  func.func @transform_3(%arg0: i32) -> (i32, i32) {
    %c0_i32 = arith.constant 0 : i32
    %c0_i32_0 = arith.constant 0 : i32
    %c0_i32_1 = arith.constant 0 : i32
    return %c0_i32, %c0_i32_0 : i32, i32
  }
  func.func @transform_4(%arg0: i32) -> (i32, i32) {
    %c0_i32 = arith.constant 0 : i32
    %c0_i32_0 = arith.constant 0 : i32
    %c0_i32_1 = arith.constant 0 : i32
    return %c0_i32, %c0_i32_0 : i32, i32
  }
  func.func @transform_5(%arg0: i32) -> (i32, i32) {
    %c0_i32 = arith.constant 0 : i32
    %c0_i32_0 = arith.constant 0 : i32
    %c0_i32_1 = arith.constant 0 : i32
    return %c0_i32, %c0_i32_0 : i32, i32
  }
  func.func @transform_6(%arg0: i32) -> (i32, i32) {
    %c0_i32 = arith.constant 0 : i32
    %c0_i32_0 = arith.constant 0 : i32
    %c0_i32_1 = arith.constant 0 : i32
    return %c0_i32, %c0_i32_0 : i32, i32
  }
  func.func @transform_7(%arg0: i32) -> (i32, i32) {
    %c0_i32 = arith.constant 0 : i32
    %c0_i32_0 = arith.constant 0 : i32
    %c0_i32_1 = arith.constant 0 : i32
    return %c0_i32, %c0_i32_0 : i32, i32
  }
  func.func @transform_8(%arg0: i32) -> (i32, i32) {
    %c0_i32 = arith.constant 0 : i32
    %c0_i32_0 = arith.constant 0 : i32
    %c0_i32_1 = arith.constant 0 : i32
    return %c0_i32, %c0_i32_0 : i32, i32
  }
  func.func @transform_9(%arg0: i32) -> (i32, i32) {
    %c0_i32 = arith.constant 0 : i32
    %c0_i32_0 = arith.constant 0 : i32
    return %arg0, %c0_i32 : i32, i32
  }
}

</mosaic_0001>

<bundles_post_ra>
// kernel: critic_forward.1
= control target key start
LH: loop header
LB: loop body
LE: loop exit
PB: predicated region body
PF: predicated region fallthrough
CT: control target
= control target key end

     0   :  { %14 = vsyncpa [#allocation3], 0  ;;  %s815_s0 = inlined_call_operand.vmem [shape: f32[2,8], index: 0, kind: input, shape index: {}]   ;;  %s816_s1 = inlined_call_operand.hbm [shape: f32[2,4], index: 1, kind: input, shape index: {}]   ;;  %s817_s2 = inlined_call_operand.vmem [shape: f32[8,64], index: 2, kind: input, shape index: {}]   ;;  %s818_s3 = inlined_call_operand.hbm [shape: f32[4,64], index: 3, kind: input, shape index: {}]   ;;  %s819_s4 = inlined_call_operand.hbm [shape: f32[1,64], index: 4, kind: input, shape index: {}]   ;;  %s820_s5 = inlined_call_operand.vmem [shape: f32[64,64], index: 5, kind: input, shape index: {}]   ;;  %s821_s6 = inlined_call_operand.hbm [shape: f32[1,64], index: 6, kind: input, shape index: {}]   ;;  %s822_s7 = inlined_call_operand.vmem [shape: f32[64,2], index: 7, kind: input, shape index: {}]   ;;  %s823_s8 = inlined_call_operand.vmem [shape: f32[1,2], index: 8, kind: input, shape index: {}]   ;;  %s824_s9 = inlined_call_operand.vmem [shape: f32[2,2], index: 9, kind: output, shape index: {}]  }
   0x1   :  { %15 = vsyncpa [#allocation5], 0 }
   0x2   :  { %16 = vsyncpa [#allocation8], 0 }
   0x3   :  { %23 = vsyncadd [#allocation3], 96  ;;  %s657_s30 = smov [#allocation4]   ;;  %s658_s11 = smov [#allocation2]  }
   0x4   :  { %s39_s10 = sshll.u32 %s657_s30, 4  ;;  %s24_s12 = sshll.u32 %s658_s11, 4  ;;  %s40_s10 = int_to_ptr.vmem [resolvable:$true] %s39_s10  ;;  %s25_s12 = int_to_ptr.vmem [resolvable:$true] %s24_s12 }
   0x5   :  { %s579_s13 = scalar_lea.vmem %s40_s10, 64  ;;  %p584_p1 = scmp.lt.s32.totalorder %s40_s10, %s40_s10 }
   0x6   :  { %p580_p0 = scmp.ne.s32.totalorder %s40_s10, %s579_s13  ;;  %p585_p2 = scmp.lt.s32.totalorder %s579_s13, %s579_s13 }
   0x8   :  { %p586_p3 = por %p585_p2, %p584_p1 }
   0xa   :  { %p587_p4 = pnand %p586_p3, %p580_p0 }
   0xc   :  { %590 = shalt.err (!%p587_p4)
}
   0xd   :  { %42 = dma.hbm_to_vmem [thread:$0]  %s818_s3, 64, %s40_s10, [#allocation5]  }
   0xe   :  { %s599_s16 = scalar_lea.vmem %s25_s12, 32  ;;  %s603_s17 = scalar_lea.vmem %s25_s12, 128 }
   0xf   :  { %p600_p5 = scmp.ne.s32.totalorder %s25_s12, %s599_s16  ;;  %p604_p6 = scmp.lt.s32.totalorder %s25_s12, %s25_s12 }
  0x10   :  { %p605_p7 = scmp.lt.s32.totalorder %s603_s17, %s599_s16 }
  0x12   :  { %p606_p8 = por %p605_p7, %p604_p6 }
  0x14   :  { %p607_p9 = pnand %p606_p8, %p600_p5 }
  0x16   :  { %610 = shalt.err (!%p607_p9)
}
  0x17   :  { %s659_s18 = smov 32   ;;  %s660_s19 = smov 2  }
  0x18   :  { %30 = dma.hbm_to_vmem [thread:$0]  %s816_s1, 32, %s25_s12, [#allocation3], %s659_s18, %s659_s18, %s660_s19  }
  0x19   :  { %s661_s22 = smov [#allocation6]   ;;  %s662_s24 = smov [#allocation7]  }
  0x1a   :  { %s49_s23 = sshll.u32 %s661_s22, 4  ;;  %s61_s25 = sshll.u32 %s662_s24, 4  ;;  %s50_s23 = int_to_ptr.vmem [resolvable:$true] %s49_s23  ;;  %s62_s25 = int_to_ptr.vmem [resolvable:$true] %s61_s25 }
  0x1b   :  { %s619_s3 = scalar_lea.vmem %s50_s23, 16  ;;  %s623_s26 = scalar_lea.vmem %s50_s23, 32 }
  0x1c   :  { %p620_p10 = scmp.ne.s32.totalorder %s50_s23, %s619_s3  ;;  %p624_p11 = scmp.lt.s32.totalorder %s50_s23, %s50_s23 }
  0x1d   :  { %p625_p12 = scmp.lt.s32.totalorder %s623_s26, %s619_s3 }
  0x1f   :  { %p626_p13 = por %p625_p12, %p624_p11 }
  0x21   :  { %p627_p0 = pnand %p626_p13, %p620_p10 }
  0x23   :  { %630 = shalt.err (!%p627_p0)
}
  0x24   :  { %52 = dma.hbm_to_vmem [thread:$0]  %s819_s4, 16, %s50_s23, [#allocation5]  }
  0x25   :  { %s639_s29 = scalar_lea.vmem %s62_s25, 16  ;;  %s643_s1 = scalar_lea.vmem %s62_s25, 32 }
  0x26   :  { %p640_p1 = scmp.ne.s32.totalorder %s62_s25, %s639_s29  ;;  %p644_p2 = scmp.lt.s32.totalorder %s62_s25, %s62_s25 }
  0x27   :  { %p645_p3 = scmp.lt.s32.totalorder %s643_s1, %s639_s29 }
  0x29   :  { %p646_p4 = por %p645_p3, %p644_p2 }
  0x2b   :  { %p647_p5 = pnand %p646_p4, %p640_p1 }
  0x2d   :  { %650 = shalt.err (!%p647_p5)
}
  0x2e   :  { %64 = dma.hbm_to_vmem [thread:$0]  %s821_s6, 16, %s62_s25, [#allocation8]  }
  0x2f   :  { %651 = dma.done.wait [#allocation3], 128  }
  0x30   :  { %652 = vsyncadd [#allocation3], 4294967168 }
  0x31   :  { %653 = dma.done.wait [#allocation5], 80  }
  0x32   :  { %654 = vsyncadd [#allocation5], 4294967216 }
  0x33   :  { %655 = dma.done.wait [#allocation8], 16  }
  0x34   :  { %656 = vsyncadd [#allocation8], 4294967280  ;;  %v663_v0 = vmov 0.0   ;;  %vm664_vm0 = vmmov 0   ;;  %vm89_vm1 = vcmask 1043456   ;;  %vm85_vm2 = vcmask 31744  }
  0x35   :  { %507 = vmatprep.subr.mxu0 %v663_v0  ;;  %512 = vmatprep.subr.mxu1 %v663_v0  ;;  %vm163_vm3 = vcmask 64512   ;;  %v84_v1 = vld [vmem:[#allocation4] sm:$0xf]  ;;  %v82_v2 = vld [vmem:[%s817_s2] sm:$0xff]  ;;  %v253_v5 = vld [vmem:[%s820_s5 + $0x38] sm:$0xff]  ;;  %vm261_vm4 = vcmask 523264  }
  0x36   :  { %509 = vmatprep.mubr.msk.f32.mxu0 %vm664_vm0, %v663_v0  ;;  %514 = vmatprep.mubr.msk.f32.mxu1 %vm664_vm0, %v663_v0  ;;  %v83_v3 = vld [vmem:[#allocation2] sm:$0xff]  ;;  %v252_v6 = vld [vmem:[%s820_s5 + $0x30] sm:$0xff]  ;;  %v251_v7 = vld [vmem:[%s820_s5 + $0x28] sm:$0xff]  ;;  %vm430_vm5 = vcmask 15360  }
  0x37   :  { %508 = vmatpush3.msk.msra.mxu0 %vm89_vm1, %v84_v1  ;;  %513 = vmatpush3.msra.mxu1 %v82_v2  ;;  %v81_v4 = vld [vmem:[%s815_s0] sm:$0xff]  ;;  %v249_v9 = vld [vmem:[%s820_s5 + $0x18] sm:$0xff]  ;;  %v248_v10 = vld [vmem:[%s820_s5 + $0x10] sm:$0xff] }
  0x38   :  { %510 = vmatmul.mubr.msk.f32.vlgmr.msra.gmra.mxu0 %vm85_vm2, %v83_v3  ;;  %515 = vmatmul.mubr.msk.f32.vlgmr.msra.gmra.mxu1 %vm163_vm3, %v81_v4  ;;  %v250_v8 = vld [vmem:[%s820_s5 + $0x20] sm:$0xff]  ;;  %v247_v11 = vld [vmem:[%s820_s5 + $0x8] sm:$0xff]  ;;  %v343_v21 = vld [vmem:[%s822_s7 + $0x38] sm:$0xff] }
  0x39   :  { %517 = vmatprep.subr.mxu0 %v663_v0  ;;  %533 = vmatprep.mubr.msk.f32.mxu0 %vm664_vm0, %v663_v0  ;;  %v246_v12 = vld [vmem:[%s820_s5] sm:$0xff]  ;;  %v479_v15 = vld [vmem:[#allocation6] ss:$0 sm:$0xff]  ;;  %v342_v22 = vld [vmem:[%s822_s7 + $0x30] sm:$0xff] }
  0x3a   :  { %536 = vmatprep.subr.mxu1 %v663_v0  ;;  %552 = vmatprep.mubr.msk.f32.mxu1 %vm664_vm0, %v663_v0  ;;  %v341_v23 = vld [vmem:[%s822_s7 + $0x28] sm:$0xff]  ;;  %v340_v24 = vld [vmem:[%s822_s7 + $0x20] sm:$0xff]  ;;  %v339_v25 = vld [vmem:[%s822_s7 + $0x18] sm:$0xff] }
  0x3b   :  { %518 = vmatpush3.msra.mxu0 %v253_v5  ;;  %537 = vmatpush3.msra.mxu1 %v343_v21  ;;  %v338_v26 = vld [vmem:[%s822_s7 + $0x10] sm:$0xff]  ;;  %v337_v27 = vld [vmem:[%s822_s7 + $0x8] sm:$0xff]  ;;  %v336_v28 = vld [vmem:[%s822_s7] sm:$0xff] }
  0x3c   :  { %519 = vmatprep.subr.mxu0 %v663_v0  ;;  %538 = vmatprep.subr.mxu1 %v663_v0  ;;  %v480_v29 = vld [vmem:[#allocation7] ss:$0 sm:$0xff]  ;;  %v482_v34 = vld [vmem:[%s823_s8] ss:$0 sm:$0xff] }
  0x3d   :  { %520 = vmatpush3.msra.mxu0 %v252_v6  ;;  %539 = vmatpush3.msra.mxu1 %v342_v22 }
  0x3e   :  { %521 = vmatprep.subr.mxu0 %v663_v0  ;;  %540 = vmatprep.subr.mxu1 %v663_v0 }
  0x3f   :  { %522 = vmatpush3.msra.mxu0 %v251_v7  ;;  %541 = vmatpush3.msra.mxu1 %v341_v23 }
  0x40   :  { %523 = vmatprep.subr.mxu0 %v663_v0  ;;  %542 = vmatprep.subr.mxu1 %v663_v0 }
  0x41   :  { %524 = vmatpush3.msra.mxu0 %v250_v8  ;;  %543 = vmatpush3.msra.mxu1 %v340_v24 }
  0x42   :  { %525 = vmatprep.subr.mxu0 %v663_v0  ;;  %544 = vmatprep.subr.mxu1 %v663_v0 }
  0x43   :  { %526 = vmatpush3.msra.mxu0 %v249_v9  ;;  %545 = vmatpush3.msra.mxu1 %v339_v25 }
  0x44   :  { %527 = vmatprep.subr.mxu0 %v663_v0  ;;  %546 = vmatprep.subr.mxu1 %v663_v0 }
  0x45   :  { %528 = vmatpush3.msra.mxu0 %v248_v10  ;;  %547 = vmatpush3.msra.mxu1 %v338_v26 }
  0x46   :  { %529 = vmatprep.subr.mxu0 %v663_v0  ;;  %548 = vmatprep.subr.mxu1 %v663_v0 }
  0x47   :  { %530 = vmatpush3.msra.mxu0 %v247_v11  ;;  %549 = vmatpush3.msra.mxu1 %v337_v27 }
  0x48   :  { %531 = vmatprep.subr.mxu0 %v663_v0  ;;  %550 = vmatprep.subr.mxu1 %v663_v0 }
  0x49   :  { %532 = vmatpush3.msra.mxu0 %v246_v12  ;;  %551 = vmatpush3.msra.mxu1 %v336_v28 }
  0xf8   :  { %v159_v13 = vpop.f32.mrf.mxu0  ;;  %v233_v14 = vpop.f32.mrf.mxu1 }
  0xf9   :  { %v234_v16 = vadd.f32 %v233_v14, %v159_v13 }
  0xfa   :  { %v511_v17 = vpop.f32.mrf.mxu0  ;;  %v516_v18 = vpop.f32.mrf.mxu1 }
  0xfb   :  { %v244_v19 = vadd.f32 %v479_v15, %v234_v16 }
  0xfd   :  { %563 = vtanh.f32 %v244_v19 }
 0x10a   :  { %v564_v20 = vpop.eup %563 }
 0x10b   :  { %534 = vmatmul.mubr.msk.f32.vlgmr.msra.gmra.mxu0 %vm261_vm4, %v564_v20 }
 0x1cb   :  { %v331_v30 = vpop.f32.mrf.mxu0 }
 0x1cc   :  { %v332_v31 = vadd.f32 %v480_v29, %v331_v30 }
 0x1cd   :  { %v535_v32 = vpop.f32.mrf.mxu0 }
 0x1ce   :  { %565 = vtanh.f32 %v332_v31 }
 0x1db   :  { %v566_v33 = vpop.eup %565 }
 0x1dc   :  { %553 = vmatmul.mubr.msk.f32.vlgmr.msra.gmra.mxu1 %vm261_vm4, %v566_v33 }
 0x29c   :  { %v420_v35 = vpop.f32.mrf.mxu1 }
 0x29d   :  { %v421_v36 = vadd.f32 %v482_v34, %v420_v35 }
 0x29e   :  { %v554_v37 = vpop.f32.mrf.mxu1 }
 0x29f   :  { %v484_v38 = vmul.f32 -1.442695, %v421_v36 }
 0x2a1   :  { %567 = vpow2.f32 %v484_v38 }
 0x2ae   :  { %v568_v39 = vpop.eup %567 }
 0x2af   :  { %v427_v40 = vadd.f32 1.0, %v568_v39 }
 0x2b1   :  { %569 = vrcp.f32 %v427_v40 }
 0x2be   :  { %v570_v41 = vpop.eup %569 }
 0x2bf   :  { %431 = vst.msk [vmem:[#allocation9] sm:$0xff] %vm430_vm5, %v570_v41 }
 0x2c6   :  { %v450_v42 = vld [vmem:[#allocation9] sm:$0x3] }
 0x2c7   :  { %451 = vst [vmem:[%s824_s9] sm:$0x3] %v450_v42 }
 0x2c8   :  { %469 = vsyncpa [#allocation3], 1 }
 0x2c9   :  { %470 = vsyncpa [#allocation5], 1 }
 0x2ca   :  { %471 = vsyncpa [#allocation8], 1 }

</bundles_post_ra>
